<compile_context>
chip_gen: v7x
topology: tpu7x:2x2x1
jax: 0.10.0
libtpu: 0.0.40
codegen_flags: <defaults>
</compile_context>

<pallas_src>
import math

import jax
import jax.numpy as jnp
from jax.experimental import pallas as pl
from jax.experimental.pallas import tpu as pltpu

EPS = 1e-6


def _silu(x):
    # SiLU with a single EUP transcendental: sigmoid(x) = 0.5*(1 + tanh(x/2)).
    return x * (0.5 + 0.5 * jnp.tanh(0.5 * x))


def resblock_kernel(x_ref, w1_ref, b1_ref, w2_ref, b2_ref, seg_ref, o_ref):
    """One (tm, PC) tile: each 128-lane row holds P packed logical rows.

    seg_ref holds the per-segment averaging matrix (0 or 1/C, bf16-exact for the
    power-of-2 C used by the packed layout), so one MXU dot yields the
    per-logical-row mean broadcast back across that row's C lanes.
    """
    x = x_ref[...].astype(jnp.float32)            # (tm, PC) f32 math
    seg = seg_ref[...]                            # (PC, PC) bf16

    def seg_layernorm(v):
        # Mean: cancellation-sensitive -> 2-pass bf16 hi/lo split (~f32 accurate,
        # 2 MXU passes instead of 6 for f32 HIGHEST).
        hi = v.astype(jnp.bfloat16)
        lo = (v - hi.astype(jnp.float32)).astype(jnp.bfloat16)
        mu = (jnp.dot(hi, seg, preferred_element_type=jnp.float32)
              + jnp.dot(lo, seg, preferred_element_type=jnp.float32))
        vc = v - mu
        # Variance: summands are non-negative (no cancellation); one bf16 pass
        # (~2^-9 relative) is ample next to the bf16 weight matmuls.
        var = jnp.dot((vc * vc).astype(jnp.bfloat16), seg,
                      preferred_element_type=jnp.float32)
        return vc * jax.lax.rsqrt(var + EPS)

    # norm1 + SiLU + linear1 (block-diagonal replicated W1^T, bf16 single pass,
    # f32 accumulation)
    h = _silu(seg_layernorm(x)).astype(jnp.bfloat16)
    h = jnp.dot(h, w1_ref[...], preferred_element_type=jnp.float32) + b1_ref[...]

    # norm2 + SiLU + linear2
    h = _silu(seg_layernorm(h)).astype(jnp.bfloat16)
    h = jnp.dot(h, w2_ref[...], preferred_element_type=jnp.float32) + b2_ref[...]

    # residual (in_channels == out_channels, residual=True)
    o_ref[...] = (x + h).astype(o_ref.dtype)


def make_resblock(w1, b1, w2, b2, *, tm_rows=16384, vmem_limit_bytes=32 * 1024 * 1024):
    """Build a jitted ResBlock forward closed over pre-packed parameters.

    Weight layout contract: w1, w2 are (C, C) stored as W^T = weight.T, i.e.
    (in, out).  PyTorch nn.Linear.weight is (out, in) and MUST be transposed by
    the caller.  b1, b2: (C,) or (1, C).
    """
    w1 = jnp.asarray(w1)
    w2 = jnp.asarray(w2)
    C = w1.shape[0]
    assert w1.shape == (C, C) and w2.shape == (C, C), "expected square (in,out) weights"

    # Lane packing: P logical rows per 128-lane vreg row when C divides 128.
    P = 128 // C if (C <= 128 and 128 % C == 0) else 1
    # TODO(synk): when C does not divide 128 (or C > 128) this falls back to the
    # lane-sparse P=1 layout (correct, but masked-store slow; 1/C also slightly
    # inexact in bf16 for non-power-of-2 C).
    PC = P * C

    def block_diag(w):
        eye = jnp.eye(P, dtype=jnp.float32)
        return jnp.einsum("pq,io->piqo", eye, w.astype(jnp.float32)).reshape(PC, PC)

    # Resident operands pre-cast to their in-kernel compute dtypes (hoisted casts).
    w1b = block_diag(w1).astype(jnp.bfloat16)                 # (PC, PC) bf16
    w2b = block_diag(w2).astype(jnp.bfloat16)
    b1t = jnp.tile(jnp.asarray(b1, jnp.float32).reshape(1, C), (1, P))   # (1, PC) f32
    b2t = jnp.tile(jnp.asarray(b2, jnp.float32).reshape(1, C), (1, P))
    seg_id = jnp.arange(PC) // C
    seg = ((seg_id[:, None] == seg_id[None, :]).astype(jnp.float32)
           * (1.0 / C)).astype(jnp.bfloat16)                  # 1/C folded in, bf16-exact

    @jax.jit
    def fwd(x):
        B, T, Cx = x.shape
        assert Cx == C, "channel mismatch"
        rows = B * T
        dtype = x.dtype
        itemsize = jnp.dtype(dtype).itemsize

        xf = x.reshape(rows, C)
        rows_pad = ((rows + P - 1) // P) * P
        if rows_pad != rows:
            # Extra HBM pass: callers should keep B*T a multiple of P (=128//C).
            xf = jnp.pad(xf, ((0, rows_pad - rows), (0, 0)))
        n_packed = rows_pad // P
        xp = xf.reshape(n_packed, PC)

        # Row tile: big enough to amortize ~0.35us/step, small enough that
        # double-buffered I/O + f32 intermediates fit v7x's 64 MiB/TC VMEM.
        tm = max(8, ((tm_rows // P) // 8) * 8)
        if n_packed <= tm:
            if n_packed >= 16 and n_packed % 16 == 0:
                tm = n_packed // 2          # >=2 grid steps -> both v7x TCs get work
                grid = (2,)
            else:
                tm = n_packed               # single full-extent block (always legal)
                grid = (1,)
        else:
            grid = (pl.cdiv(n_packed, tm),)

        cost = pl.CostEstimate(
            flops=int(2 * n_packed * PC * PC * 8),          # 8 MXU passes per tile row
            transcendentals=int(4 * n_packed * PC),          # 2 tanh + 2 rsqrt per elem
            bytes_accessed=int(2 * n_packed * PC * itemsize
                               + 3 * PC * PC * 2 + 2 * PC * 4),
        )

        out = pl.pallas_call(
            resblock_kernel,
            out_shape=jax.ShapeDtypeStruct((n_packed, PC), dtype),
            grid=grid,
            in_specs=[
                pl.BlockSpec((tm, PC), lambda i: (i, 0)),   # x rows (streamed)
                pl.BlockSpec((PC, PC), lambda i: (0, 0)),   # block-diag W1^T (bf16, resident)
                pl.BlockSpec((1, PC),  lambda i: (0, 0)),   # b1 tiled (f32)
                pl.BlockSpec((PC, PC), lambda i: (0, 0)),   # block-diag W2^T (bf16)
                pl.BlockSpec((1, PC),  lambda i: (0, 0)),   # b2 tiled (f32)
                pl.BlockSpec((PC, PC), lambda i: (0, 0)),   # segment-mean matrix (bf16)
            ],
            out_specs=pl.BlockSpec((tm, PC), lambda i: (i, 0)),
            compiler_params=pltpu.CompilerParams(
                dimension_semantics=("parallel",),
                vmem_limit_bytes=vmem_limit_bytes,
            ),
            cost_estimate=cost,
        )(xp, w1b, b1t, w2b, b2t, seg)

        out = out.reshape(rows_pad, C)
        if rows_pad != rows:
            out = out[:rows]
        return out.reshape(B, T, C)

    return fwd


def _layernorm_ref(x):
    mu = jnp.mean(x, axis=-1, keepdims=True)
    var = jnp.mean((x - mu) ** 2, axis=-1, keepdims=True)
    return (x - mu) * jax.lax.rsqrt(var + EPS)


def reference_forward(x, w1, b1, w2, b2):
    h = _layernorm_ref(x)
    h = h * jax.nn.sigmoid(h)
    h = jnp.dot(h, w1, precision=jax.lax.Precision.HIGHEST) + jnp.asarray(b1).reshape(-1)
    h = _layernorm_ref(h)
    h = h * jax.nn.sigmoid(h)
    h = jnp.dot(h, w2, precision=jax.lax.Precision.HIGHEST) + jnp.asarray(b2).reshape(-1)
    return x + h


if __name__ == "__main__":
    B, T, C = 2, 8, 32  # in_channels == out_channels == 32

    key = jax.random.PRNGKey(0)
    kx, kw1, kb1, kw2, kb2 = jax.random.split(key, 5)

    x = jax.random.normal(kx, (B, T, C), dtype=jnp.float32)

    # torch.nn.Linear-style uniform init, bound 1/sqrt(fan_in).
    # Weights are stored transposed (in, out) = nn.Linear.weight.T so the
    # kernel computes h @ W^T directly.
    bound = 1.0 / math.sqrt(C)
    w1 = jax.random.uniform(kw1, (C, C), jnp.float32, -bound, bound)
    b1 = jax.random.uniform(kb1, (1, C), jnp.float32, -bound, bound)
    w2 = jax.random.uniform(kw2, (C, C), jnp.float32, -bound, bound)
    b2 = jax.random.uniform(kb2, (1, C), jnp.float32, -bound, bound)

    fwd = make_resblock(w1, b1, w2, b2)

    out = jax.block_until_ready(fwd(x))
    ref = reference_forward(x, w1, b1, w2, b2)

    assert out.shape == (B, T, C)
    err = float(jnp.max(jnp.abs(out - ref)))
    # Weight matmuls run as single-pass bf16 with f32 accumulation (standard
    # Linear numerics), so tolerance vs the all-f32 reference is bf16-level.
    assert err < 5e-2, err

    # bf16-I/O smoke run (production path: halves HBM traffic on every gen).
    outb = jax.block_until_ready(fwd(x.astype(jnp.bfloat16)))
    assert outb.dtype == jnp.bfloat16 and outb.shape == (B, T, C)

    # TODO(synk): condition=True path (adaLN modulation from `c`) not implemented;
    # module default is condition=False and forward is called with c=None.
    print("KERNEL_OK")
</pallas_src>

<mosaic_0001>
module attributes {stable_mosaic.version = 11 : i64} {
  func.func @resblock_kernel(%arg0: i32, %arg1: memref<4x128xf32, #tpu.memory_space<vmem>>, %arg2: memref<128x128xbf16, #tpu.memory_space<vmem>>, %arg3: memref<1x128xf32, #tpu.memory_space<vmem>>, %arg4: memref<128x128xbf16, #tpu.memory_space<vmem>>, %arg5: memref<1x128xf32, #tpu.memory_space<vmem>>, %arg6: memref<128x128xbf16, #tpu.memory_space<vmem>>, %arg7: memref<4x128xf32, #tpu.memory_space<vmem>>) attributes {dimension_semantics = [#tpu.dimension_semantics<parallel>], iteration_bounds = array<i64: 1>, scalar_prefetch = 0 : i64, scratch_operands = 0 : i64, tpu.core_type = #tpu.core_type<tc>, window_params = [{transform_indices = @transform_0, window_bounds = array<i64: 4, 128>}, {pipeline_mode = #tpu.pipeline_mode<synchronous>, transform_indices = @transform_1, window_bounds = array<i64: 128, 128>}, {pipeline_mode = #tpu.pipeline_mode<synchronous>, transform_indices = @transform_2, window_bounds = array<i64: 1, 128>}, {pipeline_mode = #tpu.pipeline_mode<synchronous>, transform_indices = @transform_3, window_bounds = array<i64: 128, 128>}, {pipeline_mode = #tpu.pipeline_mode<synchronous>, transform_indices = @transform_4, window_bounds = array<i64: 1, 128>}, {pipeline_mode = #tpu.pipeline_mode<synchronous>, transform_indices = @transform_5, window_bounds = array<i64: 128, 128>}, {transform_indices = @transform_6, window_bounds = array<i64: 4, 128>}]} {
    %c0 = arith.constant 0 : index
    %c0_0 = arith.constant 0 : index
    %0 = vector.load %arg1[%c0, %c0_0] : memref<4x128xf32, #tpu.memory_space<vmem>>, vector<4x128xf32>
    %c0_1 = arith.constant 0 : index
    %c0_2 = arith.constant 0 : index
    %1 = vector.load %arg6[%c0_1, %c0_2] : memref<128x128xbf16, #tpu.memory_space<vmem>>, vector<128x128xbf16>
    %2 = arith.truncf %0 : vector<4x128xf32> to vector<4x128xbf16>
    %3 = arith.extf %2 : vector<4x128xbf16> to vector<4x128xf32>
    %4 = arith.subf %0, %3 : vector<4x128xf32>
    %5 = arith.truncf %4 : vector<4x128xf32> to vector<4x128xbf16>
    %cst = arith.constant dense<0.000000e+00> : vector<4x128xf32>
    %6 = tpu.matmul %2, %1, %cst {dimension_numbers = #tpu.dot_dimension_numbers<[1], [0], [0], [1], [0, 0, 1, 1], [], []>} : vector<4x128xbf16>, vector<128x128xbf16>, vector<4x128xf32> -> vector<4x128xf32>
    %cst_3 = arith.constant dense<0.000000e+00> : vector<4x128xf32>
    %7 = tpu.matmul %5, %1, %cst_3 {dimension_numbers = #tpu.dot_dimension_numbers<[1], [0], [0], [1], [0, 0, 1, 1], [], []>} : vector<4x128xbf16>, vector<128x128xbf16>, vector<4x128xf32> -> vector<4x128xf32>
    %8 = arith.addf %6, %7 : vector<4x128xf32>
    %9 = arith.subf %0, %8 : vector<4x128xf32>
    %10 = arith.mulf %9, %9 : vector<4x128xf32>
    %11 = arith.truncf %10 : vector<4x128xf32> to vector<4x128xbf16>
    %cst_4 = arith.constant dense<0.000000e+00> : vector<4x128xf32>
    %12 = tpu.matmul %11, %1, %cst_4 {dimension_numbers = #tpu.dot_dimension_numbers<[1], [0], [0], [1], [0, 0, 1, 1], [], []>} : vector<4x128xbf16>, vector<128x128xbf16>, vector<4x128xf32> -> vector<4x128xf32>
    %cst_5 = arith.constant 9.99999997E-7 : f32
    %13 = vector.broadcast %cst_5 : f32 to vector<4x128xf32>
    %14 = arith.addf %12, %13 : vector<4x128xf32>
    %15 = math.rsqrt %14 : vector<4x128xf32>
    %16 = arith.mulf %9, %15 : vector<4x128xf32>
    %cst_6 = arith.constant 5.000000e-01 : f32
    %17 = vector.broadcast %cst_6 : f32 to vector<4x128xf32>
    %18 = arith.mulf %17, %16 : vector<4x128xf32>
    %19 = math.tanh %18 : vector<4x128xf32>
    %cst_7 = arith.constant 5.000000e-01 : f32
    %20 = vector.broadcast %cst_7 : f32 to vector<4x128xf32>
    %21 = arith.mulf %20, %19 : vector<4x128xf32>
    %cst_8 = arith.constant 5.000000e-01 : f32
    %22 = vector.broadcast %cst_8 : f32 to vector<4x128xf32>
    %23 = arith.addf %22, %21 : vector<4x128xf32>
    %24 = arith.mulf %16, %23 : vector<4x128xf32>
    %25 = arith.truncf %24 : vector<4x128xf32> to vector<4x128xbf16>
    %c0_9 = arith.constant 0 : index
    %c0_10 = arith.constant 0 : index
    %26 = vector.load %arg2[%c0_9, %c0_10] : memref<128x128xbf16, #tpu.memory_space<vmem>>, vector<128x128xbf16>
    %cst_11 = arith.constant dense<0.000000e+00> : vector<4x128xf32>
    %27 = tpu.matmul %25, %26, %cst_11 {dimension_numbers = #tpu.dot_dimension_numbers<[1], [0], [0], [1], [0, 0, 1, 1], [], []>} : vector<4x128xbf16>, vector<128x128xbf16>, vector<4x128xf32> -> vector<4x128xf32>
    %c0_12 = arith.constant 0 : index
    %c0_13 = arith.constant 0 : index
    %28 = vector.load %arg3[%c0_12, %c0_13] : memref<1x128xf32, #tpu.memory_space<vmem>>, vector<1x128xf32>
    %29 = vector.broadcast %28 : vector<1x128xf32> to vector<4x128xf32>
    %30 = arith.addf %27, %29 : vector<4x128xf32>
    %31 = arith.truncf %30 : vector<4x128xf32> to vector<4x128xbf16>
    %32 = arith.extf %31 : vector<4x128xbf16> to vector<4x128xf32>
    %33 = arith.subf %30, %32 : vector<4x128xf32>
    %34 = arith.truncf %33 : vector<4x128xf32> to vector<4x128xbf16>
    %cst_14 = arith.constant dense<0.000000e+00> : vector<4x128xf32>
    %35 = tpu.matmul %31, %1, %cst_14 {dimension_numbers = #tpu.dot_dimension_numbers<[1], [0], [0], [1], [0, 0, 1, 1], [], []>} : vector<4x128xbf16>, vector<128x128xbf16>, vector<4x128xf32> -> vector<4x128xf32>
    %cst_15 = arith.constant dense<0.000000e+00> : vector<4x128xf32>
    %36 = tpu.matmul %34, %1, %cst_15 {dimension_numbers = #tpu.dot_dimension_numbers<[1], [0], [0], [1], [0, 0, 1, 1], [], []>} : vector<4x128xbf16>, vector<128x128xbf16>, vector<4x128xf32> -> vector<4x128xf32>
    %37 = arith.addf %35, %36 : vector<4x128xf32>
    %38 = arith.subf %30, %37 : vector<4x128xf32>
    %39 = arith.mulf %38, %38 : vector<4x128xf32>
    %40 = arith.truncf %39 : vector<4x128xf32> to vector<4x128xbf16>
    %cst_16 = arith.constant dense<0.000000e+00> : vector<4x128xf32>
    %41 = tpu.matmul %40, %1, %cst_16 {dimension_numbers = #tpu.dot_dimension_numbers<[1], [0], [0], [1], [0, 0, 1, 1], [], []>} : vector<4x128xbf16>, vector<128x128xbf16>, vector<4x128xf32> -> vector<4x128xf32>
    %cst_17 = arith.constant 9.99999997E-7 : f32
    %42 = vector.broadcast %cst_17 : f32 to vector<4x128xf32>
    %43 = arith.addf %41, %42 : vector<4x128xf32>
    %44 = math.rsqrt %43 : vector<4x128xf32>
    %45 = arith.mulf %38, %44 : vector<4x128xf32>
    %cst_18 = arith.constant 5.000000e-01 : f32
    %46 = vector.broadcast %cst_18 : f32 to vector<4x128xf32>
    %47 = arith.mulf %46, %45 : vector<4x128xf32>
    %48 = math.tanh %47 : vector<4x128xf32>
    %cst_19 = arith.constant 5.000000e-01 : f32
    %49 = vector.broadcast %cst_19 : f32 to vector<4x128xf32>
    %50 = arith.mulf %49, %48 : vector<4x128xf32>
    %cst_20 = arith.constant 5.000000e-01 : f32
    %51 = vector.broadcast %cst_20 : f32 to vector<4x128xf32>
    %52 = arith.addf %51, %50 : vector<4x128xf32>
    %53 = arith.mulf %45, %52 : vector<4x128xf32>
    %54 = arith.truncf %53 : vector<4x128xf32> to vector<4x128xbf16>
    %c0_21 = arith.constant 0 : index
    %c0_22 = arith.constant 0 : index
    %55 = vector.load %arg4[%c0_21, %c0_22] : memref<128x128xbf16, #tpu.memory_space<vmem>>, vector<128x128xbf16>
    %cst_23 = arith.constant dense<0.000000e+00> : vector<4x128xf32>
    %56 = tpu.matmul %54, %55, %cst_23 {dimension_numbers = #tpu.dot_dimension_numbers<[1], [0], [0], [1], [0, 0, 1, 1], [], []>} : vector<4x128xbf16>, vector<128x128xbf16>, vector<4x128xf32> -> vector<4x128xf32>
    %c0_24 = arith.constant 0 : index
    %c0_25 = arith.constant 0 : index
    %57 = vector.load %arg5[%c0_24, %c0_25] : memref<1x128xf32, #tpu.memory_space<vmem>>, vector<1x128xf32>
    %58 = vector.broadcast %57 : vector<1x128xf32> to vector<4x128xf32>
    %59 = arith.addf %56, %58 : vector<4x128xf32>
    %60 = arith.addf %0, %59 : vector<4x128xf32>
    %c0_26 = arith.constant 0 : index
    %c0_27 = arith.constant 0 : index
    %61 = vector.load %arg7[%c0_26, %c0_27] : memref<4x128xf32, #tpu.memory_space<vmem>>, vector<4x128xf32>
    tpu.vector_store %arg7[%c0_26, %c0_27], %60 {strides = array<i32>} : memref<4x128xf32, #tpu.memory_space<vmem>>, vector<4x128xf32>,
    return
  }
  func.func @transform_0(%arg0: i32) -> (i32, i32) {
    %c0_i32 = arith.constant 0 : i32
    %c0_i32_0 = arith.constant 0 : i32
    return %arg0, %c0_i32 : i32, i32
  }
  func.func @transform_1(%arg0: i32) -> (i32, i32) {
    %c0_i32 = arith.constant 0 : i32
    %c0_i32_0 = arith.constant 0 : i32
    %c0_i32_1 = arith.constant 0 : i32
    return %c0_i32, %c0_i32_0 : i32, i32
  }
  func.func @transform_2(%arg0: i32) -> (i32, i32) {
    %c0_i32 = arith.constant 0 : i32
    %c0_i32_0 = arith.constant 0 : i32
    %c0_i32_1 = arith.constant 0 : i32
    return %c0_i32, %c0_i32_0 : i32, i32
  }
  func.func @transform_3(%arg0: i32) -> (i32, i32) {
    %c0_i32 = arith.constant 0 : i32
    %c0_i32_0 = arith.constant 0 : i32
    %c0_i32_1 = arith.constant 0 : i32
    return %c0_i32, %c0_i32_0 : i32, i32
  }
  func.func @transform_4(%arg0: i32) -> (i32, i32) {
    %c0_i32 = arith.constant 0 : i32
    %c0_i32_0 = arith.constant 0 : i32
    %c0_i32_1 = arith.constant 0 : i32
    return %c0_i32, %c0_i32_0 : i32, i32
  }
  func.func @transform_5(%arg0: i32) -> (i32, i32) {
    %c0_i32 = arith.constant 0 : i32
    %c0_i32_0 = arith.constant 0 : i32
    %c0_i32_1 = arith.constant 0 : i32
    return %c0_i32, %c0_i32_0 : i32, i32
  }
  func.func @transform_6(%arg0: i32) -> (i32, i32) {
    %c0_i32 = arith.constant 0 : i32
    %c0_i32_0 = arith.constant 0 : i32
    return %arg0, %c0_i32 : i32, i32
  }
}

</mosaic_0001>

<bundles_post_ra>
// kernel: fwd.1
= control target key start
LH: loop header
LB: loop body
LE: loop exit
PB: predicated region body
PF: predicated region fallthrough
CT: control target
= control target key end

     0   :  { %11 = vsyncpa [#allocation3], 0  ;;  %s1262_s0 = inlined_call_operand.vmem [shape: f32[4,128], index: 0, kind: input, shape index: {}]   ;;  %s1263_s1 = inlined_call_operand.hbm [shape: bf16[128,128], index: 1, kind: input, shape index: {}]   ;;  %s1264_s2 = inlined_call_operand.vmem [shape: f32[1,128], index: 2, kind: input, shape index: {}]   ;;  %s1265_s3 = inlined_call_operand.hbm [shape: bf16[128,128], index: 3, kind: input, shape index: {}]   ;;  %s1266_s4 = inlined_call_operand.vmem [shape: f32[1,128], index: 4, kind: input, shape index: {}]   ;;  %s1267_s5 = inlined_call_operand.hbm [shape: bf16[128,128], index: 5, kind: input, shape index: {}]   ;;  %s1268_s6 = inlined_call_operand.vmem [shape: f32[4,128], index: 6, kind: output, shape index: {}]  }
   0x1   :  { %12 = vsyncpa [#allocation5], 0  ;;  %s1005_s21 = smov [#allocation4]   ;;  %s1006_s23 = smov [#allocation2]  }
   0x2   :  { %s34_s22 = sshll.u32 %s1005_s21, 4  ;;  %s20_s24 = sshll.u32 %s1006_s23, 4  ;;  %s35_s22 = int_to_ptr.vmem [resolvable:$true] %s34_s22  ;;  %s1047_s24 = int_to_ptr.vmem [resolvable:$true] %s20_s24 }
   0x3   :  { %s935_s27 = scalar_lea.hbm %s1265_s3, 1024 }
   0x4   :  { %p936_p0 = scmp.ne.s32.totalorder %s1265_s3, %s935_s27  ;;  %p939_p1 = scmp.lt.u32.totalorder %s935_s27, %s1265_s3 }
   0x6   :  { %p941_p2 = pnand %p939_p1, %p936_p0 }
   0x8   :  { %944 = shalt.err (!%p941_p2)
}
   0x9   :  { %s945_s8 = scalar_lea.vmem %s35_s22, 1024  ;;  %p950_p4 = scmp.lt.s32.totalorder %s35_s22, %s35_s22 }
   0xa   :  { %p946_p3 = scmp.ne.s32.totalorder %s35_s22, %s945_s8  ;;  %p951_p5 = scmp.lt.s32.totalorder %s945_s8, %s945_s8 }
   0xc   :  { %p952_p6 = por %p951_p5, %p950_p4 }
   0xe   :  { %p953_p7 = pnand %p952_p6, %p946_p3 }
  0x10   :  { %956 = shalt.err (!%p953_p7)
}
  0x11   :  { %s1007_s9 = smov 64   ;;  %s1008_s10 = smov 4  }
  0x12   :  { %40 = dma.hbm_to_vmem [thread:$0]  %s1265_s3, 1024, %s35_s22, [#allocation5], %s1007_s9, %s1007_s9, %s1008_s10  }
  0x13   :  { %s957_s15 = scalar_lea.hbm %s1263_s1, 1024 }
  0x14   :  { %p958_p8 = scmp.ne.s32.totalorder %s1263_s1, %s957_s15  ;;  %p961_p9 = scmp.lt.u32.totalorder %s957_s15, %s1263_s1 }
  0x16   :  { %p963_p10 = pnand %p961_p9, %p958_p8 }
  0x18   :  { %966 = shalt.err (!%p963_p10)
}
  0x19   :  { %s967_s20 = scalar_lea.vmem %s1047_s24, 1024  ;;  %p972_p12 = scmp.lt.s32.totalorder %s1047_s24, %s1047_s24 }
  0x1a   :  { %p968_p11 = scmp.ne.s32.totalorder %s1047_s24, %s967_s20  ;;  %p973_p13 = scmp.lt.s32.totalorder %s967_s20, %s967_s20 }
  0x1c   :  { %p974_p0 = por %p973_p13, %p972_p12 }
  0x1e   :  { %p975_p1 = pnand %p974_p0, %p968_p11 }
  0x20   :  { %978 = shalt.err (!%p975_p1)
}
  0x21   :  { %26 = dma.hbm_to_vmem [thread:$0]  %s1263_s1, 1024, %s1047_s24, [#allocation3], %s1007_s9, %s1007_s9, %s1008_s10  }
  0x22   :  { %s1009_s22 = smov [#allocation6]   ;;  %s979_s27 = scalar_lea.hbm %s1267_s5, 1024 }
  0x23   :  { %s48_s23 = sshll.u32 %s1009_s22, 4  ;;  %p980_p2 = scmp.ne.s32.totalorder %s1267_s5, %s979_s27  ;;  %s49_s23 = int_to_ptr.vmem [resolvable:$true] %s48_s23 }
  0x24   :  { %p983_p3 = scmp.lt.u32.totalorder %s979_s27, %s1267_s5 }
  0x26   :  { %p985_p4 = pnand %p983_p3, %p980_p2 }
  0x28   :  { %988 = shalt.err (!%p985_p4)
}
  0x29   :  { %s989_s8 = scalar_lea.vmem %s49_s23, 1024  ;;  %p994_p6 = scmp.lt.s32.totalorder %s49_s23, %s49_s23 }
  0x2a   :  { %p990_p5 = scmp.ne.s32.totalorder %s49_s23, %s989_s8  ;;  %p995_p7 = scmp.lt.s32.totalorder %s989_s8, %s989_s8 }
  0x2c   :  { %p996_p8 = por %p995_p7, %p994_p6 }
  0x2e   :  { %p997_p9 = pnand %p996_p8, %p990_p5 }
  0x30   :  { %1000 = shalt.err (!%p997_p9)
}
  0x31   :  { %54 = dma.hbm_to_vmem [thread:$0]  %s1267_s5, 1024, %s49_s23, [#allocation5], %s1007_s9, %s1007_s9, %s1008_s10  }
  0x32   :  { %1001 = dma.done.wait [#allocation3], 1024  }
  0x33   :  { %1002 = vsyncadd [#allocation3], 4294966272 }
  0x34   :  { %1003 = dma.done.wait [#allocation5], 2048  }
  0x35   :  { %1004 = vsyncadd [#allocation5], 4294965248  ;;  %v1010_v0 = vmov 0.0   ;;  %vm1011_vm0 = vmmov 0   ;;  %v1105_v1 = vld [vmem:[#allocation6] sm:$0xff]   ;;  %v1108_v2 = vld [vmem:[#allocation6 + $0x8] sm:$0xff]  }
  0x36   :  { %728 = vmatprep.subr.bf16.mxu0 %v1010_v0  ;;  %744 = vmatprep.mubr.msk.bf16.mxu0 %vm1011_vm0, %v1010_v0  ;;  %v1114_v3 = vld [vmem:[#allocation6 + $0x10] sm:$0xff]   ;;  %v1119_v4 = vld [vmem:[#allocation6 + $0x18] sm:$0xff]   ;;  %v1125_v5 = vld [vmem:[#allocation6 + $0x20] sm:$0xff]  }
  0x37   :  { %768 = vmatprep.subr.bf16.mxu1 %v1010_v0  ;;  %784 = vmatprep.mubr.msk.bf16.mxu1 %vm1011_vm0, %v1010_v0  ;;  %v1130_v6 = vld [vmem:[%s1262_s0] sm:$0xf]  ;;  %v1136_v7 = vld [vmem:[#allocation6 + $0x28] sm:$0xff]   ;;  %v1145_v10 = vld [vmem:[#allocation6 + $0x30] sm:$0xff]  }
  0x38   :  { %729 = vmatpush3.bf16.msra.mxu0 %v1105_v1  ;;  %769 = vmatpush3.bf16.msra.mxu1 %v1105_v1  ;;  %v82_v8 = vpack.c.bf16 %v1130_v6, %v1130_v6  ;;  %v1152_v12 = vld [vmem:[#allocation6 + $0x38] sm:$0xff]   ;;  %v911_v21 = vld [vmem:[#allocation2] sm:$0xff]   ;;  %v912_v22 = vld [vmem:[#allocation2 + $0x8] sm:$0xff]  }
  0x39   :  { %730 = vmatprep.subr.bf16.mxu0 %v1010_v0  ;;  %770 = vmatprep.subr.bf16.mxu1 %v1010_v0  ;;  %v913_v23 = vld [vmem:[#allocation2 + $0x10] sm:$0xff]   ;;  %v914_v24 = vld [vmem:[#allocation2 + $0x18] sm:$0xff]   ;;  %v915_v25 = vld [vmem:[#allocation2 + $0x20] sm:$0xff]  }
  0x3a   :  { %v83_v9 = vunpack.c.l.bf16 %v82_v8  ;;  %v916_v26 = vld [vmem:[#allocation2 + $0x28] sm:$0xff]   ;;  %v917_v27 = vld [vmem:[#allocation2 + $0x30] sm:$0xff]   ;;  %v918_v28 = vld [vmem:[#allocation2 + $0x38] sm:$0xff]  }
  0x3b   :  { %v638_v42 = vld [vmem:[%s1264_s2] ss:$0 sm:$0xff]  ;;  %v920_v60 = vld [vmem:[#allocation4 + $0x8] sm:$0xff]   ;;  %v921_v61 = vld [vmem:[#allocation4 + $0x10] sm:$0xff]  }
  0x3c   :  { %731 = vmatpush3.bf16.msra.mxu0 %v1108_v2  ;;  %771 = vmatpush3.bf16.msra.mxu1 %v1108_v2  ;;  %v84_v11 = vsub.f32 %v1130_v6, %v83_v9  ;;  %v919_v59 = vld [vmem:[#allocation4] sm:$0xff]   ;;  %v922_v62 = vld [vmem:[#allocation4 + $0x18] sm:$0xff]  }
  0x3d   :  { %732 = vmatprep.subr.bf16.mxu0 %v1010_v0  ;;  %772 = vmatprep.subr.bf16.mxu1 %v1010_v0  ;;  %v923_v63 = vld [vmem:[#allocation4 + $0x20] sm:$0xff]  }
  0x3e   :  { %v85_v13 = vpack.c.bf16 %v84_v11, %v84_v11 }
  0x40   :  { %733 = vmatpush3.bf16.msra.mxu0 %v1114_v3  ;;  %773 = vmatpush3.bf16.msra.mxu1 %v1114_v3 }
  0x41   :  { %734 = vmatprep.subr.bf16.mxu0 %v1010_v0  ;;  %774 = vmatprep.subr.bf16.mxu1 %v1010_v0 }
  0x44   :  { %735 = vmatpush3.bf16.msra.mxu0 %v1119_v4  ;;  %775 = vmatpush3.bf16.msra.mxu1 %v1119_v4 }
  0x45   :  { %736 = vmatprep.subr.bf16.mxu0 %v1010_v0  ;;  %776 = vmatprep.subr.bf16.mxu1 %v1010_v0 }
  0x48   :  { %737 = vmatpush3.bf16.msra.mxu0 %v1125_v5  ;;  %777 = vmatpush3.bf16.msra.mxu1 %v1125_v5 }
  0x49   :  { %738 = vmatprep.subr.bf16.mxu0 %v1010_v0  ;;  %778 = vmatprep.subr.bf16.mxu1 %v1010_v0 }
  0x4c   :  { %739 = vmatpush3.bf16.msra.mxu0 %v1136_v7  ;;  %779 = vmatpush3.bf16.msra.mxu1 %v1136_v7 }
  0x4d   :  { %740 = vmatprep.subr.bf16.mxu0 %v1010_v0  ;;  %780 = vmatprep.subr.bf16.mxu1 %v1010_v0 }
  0x50   :  { %741 = vmatpush3.bf16.msra.mxu0 %v1145_v10  ;;  %781 = vmatpush3.bf16.msra.mxu1 %v1145_v10 }
  0x51   :  { %742 = vmatprep.subr.bf16.mxu0 %v1010_v0  ;;  %782 = vmatprep.subr.bf16.mxu1 %v1010_v0 }
  0x54   :  { %743 = vmatpush3.bf16.msra.mxu0 %v1152_v12  ;;  %783 = vmatpush3.bf16.msra.mxu1 %v1152_v12 }
  0x55   :  { %748 = vmatprep.subr.bf16.mxu0 %v1010_v0  ;;  %788 = vmatprep.subr.bf16.mxu1 %v1010_v0 }
  0x57   :  { %745 = vmatmul.mubr.bf16.vlgmr.msra.gmra.mrb[0].mxu0 %v85_v13 }
  0x58   :  { %749 = vmatpush3.bf16.msra.mxu0 %v1105_v1  ;;  %764 = vmatprep.mubr.msk.bf16.mxu0 %vm1011_vm0, %v1010_v0 }
  0x59   :  { %750 = vmatprep.subr.bf16.mxu0 %v1010_v0 }
  0x5c   :  { %751 = vmatpush3.bf16.msra.mxu0 %v1108_v2 }
  0x5d   :  { %752 = vmatprep.subr.bf16.mxu0 %v1010_v0 }
  0x60   :  { %753 = vmatpush3.bf16.msra.mxu0 %v1114_v3 }
  0x61   :  { %754 = vmatprep.subr.bf16.mxu0 %v1010_v0 }
  0x64   :  { %755 = vmatpush3.bf16.msra.mxu0 %v1119_v4 }
  0x65   :  { %756 = vmatprep.subr.bf16.mxu0 %v1010_v0 }
  0x68   :  { %757 = vmatpush3.bf16.msra.mxu0 %v1125_v5 }
  0x69   :  { %758 = vmatprep.subr.bf16.mxu0 %v1010_v0 }
  0x6c   :  { %759 = vmatpush3.bf16.msra.mxu0 %v1136_v7 }
  0x6d   :  { %760 = vmatprep.subr.bf16.mxu0 %v1010_v0 }
  0x70   :  { %761 = vmatpush3.bf16.msra.mxu0 %v1145_v10 }
  0x71   :  { %762 = vmatprep.subr.bf16.mxu0 %v1010_v0 }
  0x74   :  { %763 = vmatpush3.bf16.msra.mxu0 %v1152_v12 }
  0x75   :  { %808 = vmatprep.subr.bf16.mxu0 %v1010_v0 }
  0x77   :  { %765 = vmatmul.mubr.bf16.vlgmr.msra.gmra.mrb[0].mxu0 %v82_v8 }
  0x78   :  { %809 = vmatpush3.bf16.msra.mxu0 %v1105_v1  ;;  %824 = vmatprep.mubr.msk.bf16.mxu0 %vm1011_vm0, %v1010_v0 }
  0x79   :  { %810 = vmatprep.subr.bf16.mxu0 %v1010_v0 }
  0x7c   :  { %811 = vmatpush3.bf16.msra.mxu0 %v1108_v2 }
  0x7d   :  { %812 = vmatprep.subr.bf16.mxu0 %v1010_v0 }
  0x80   :  { %813 = vmatpush3.bf16.msra.mxu0 %v1114_v3 }
  0x81   :  { %814 = vmatprep.subr.bf16.mxu0 %v1010_v0 }
  0x84   :  { %815 = vmatpush3.bf16.msra.mxu0 %v1119_v4 }
  0x85   :  { %816 = vmatprep.subr.bf16.mxu0 %v1010_v0 }
  0x88   :  { %817 = vmatpush3.bf16.msra.mxu0 %v1125_v5 }
  0x89   :  { %818 = vmatprep.subr.bf16.mxu0 %v1010_v0 }
  0x8c   :  { %819 = vmatpush3.bf16.msra.mxu0 %v1136_v7 }
  0x8d   :  { %820 = vmatprep.subr.bf16.mxu0 %v1010_v0 }
  0x90   :  { %821 = vmatpush3.bf16.msra.mxu0 %v1145_v10 }
  0x91   :  { %822 = vmatprep.subr.bf16.mxu0 %v1010_v0 }
  0x94   :  { %823 = vmatpush3.bf16.msra.mxu0 %v1152_v12 }
  0x95   :  { %828 = vmatprep.subr.bf16.mxu0 %v1010_v0 }
 0x14a   :  { %v208_v14 = vpop.f32.mrb[0].mxu0 }
 0x14b   :  { %v214_v15 = vsub.f32 %v1130_v6, %v208_v14  ;;  %v766_v16 = vpop.f32.mrb[1].mxu0 }
 0x14c   :  { %v211_v17 = vpop.f32.mrb[2].mxu0 }
 0x14d   :  { %v215_v18 = vmul.f32 %v214_v15, %v214_v15  ;;  %v767_v19 = vpop.f32.mrb[3].mxu0 }
 0x14f   :  { %v216_v20 = vpack.c.bf16 %v215_v18, %v215_v18 }
 0x151   :  { %785 = vmatmul.mubr.bf16.vlgmr.msra.gmra.mrb[0].mxu1 %v216_v20 }
 0x152   :  { %804 = vmatprep.mubr.msk.bf16.mxu1 %vm1011_vm0, %v1010_v0  ;;  %789 = vmatpush3.bf16.msra.mxu1 %v911_v21 }
 0x153   :  { %790 = vmatprep.subr.bf16.mxu1 %v1010_v0 }
 0x156   :  { %791 = vmatpush3.bf16.msra.mxu1 %v912_v22 }
 0x157   :  { %792 = vmatprep.subr.bf16.mxu1 %v1010_v0 }
 0x15a   :  { %793 = vmatpush3.bf16.msra.mxu1 %v913_v23 }
 0x15b   :  { %794 = vmatprep.subr.bf16.mxu1 %v1010_v0 }
 0x15e   :  { %795 = vmatpush3.bf16.msra.mxu1 %v914_v24 }
 0x15f   :  { %796 = vmatprep.subr.bf16.mxu1 %v1010_v0 }
 0x162   :  { %797 = vmatpush3.bf16.msra.mxu1 %v915_v25 }
 0x163   :  { %798 = vmatprep.subr.bf16.mxu1 %v1010_v0 }
 0x166   :  { %799 = vmatpush3.bf16.msra.mxu1 %v916_v26 }
 0x167   :  { %800 = vmatprep.subr.bf16.mxu1 %v1010_v0 }
 0x16a   :  { %801 = vmatpush3.bf16.msra.mxu1 %v917_v27 }
 0x16b   :  { %802 = vmatprep.subr.bf16.mxu1 %v1010_v0 }
 0x16e   :  { %803 = vmatpush3.bf16.msra.mxu1 %v918_v28 }
 0x16f   :  { %848 = vmatprep.subr.bf16.mxu1 %v1010_v0 }
 0x224   :  { %v251_v29 = vpop.f32.mrb[0].mxu1 }
 0x225   :  { %v252_v30 = vadd.f32 1e-06, %v251_v29  ;;  %v786_v31 = vpop.f32.mrb[1].mxu1 }
 0x226   :  { %v254_v32 = vpop.f32.mrb[2].mxu1 }
 0x227   :  { %927 = vrsqrt.f32 %v252_v30  ;;  %v787_v33 = vpop.f32.mrb[3].mxu1 }
 0x231   :  { %v928_v34 = vpop.eup %927 }
 0x232   :  { %v258_v35 = vmul.f32 %v928_v34, %v214_v15 }
 0x234   :  { %v259_v36 = vmul.f32 0.5, %v258_v35 }
 0x236   :  { %929 = vtanh.f32 %v259_v36 }
 0x240   :  { %v930_v37 = vpop.eup %929 }
 0x241   :  { %v261_v38 = vmul.f32 0.5, %v930_v37 }
 0x243   :  { %v262_v39 = vadd.f32 0.5, %v261_v38 }
 0x245   :  { %v263_v40 = vmul.f32 %v262_v39, %v258_v35 }
 0x247   :  { %v264_v41 = vpack.c.bf16 %v263_v40, %v263_v40 }
 0x249   :  { %805 = vmatmul.mubr.bf16.vlgmr.msra.gmra.mrb[4].mxu1 %v264_v41 }
 0x24a   :  { %849 = vmatpush3.bf16.msra.mxu1 %v1105_v1  ;;  %864 = vmatprep.mubr.msk.bf16.mxu1 %vm1011_vm0, %v1010_v0 }
 0x24b   :  { %850 = vmatprep.subr.bf16.mxu1 %v1010_v0 }
 0x24e   :  { %851 = vmatpush3.bf16.msra.mxu1 %v1108_v2 }
 0x24f   :  { %852 = vmatprep.subr.bf16.mxu1 %v1010_v0 }
 0x252   :  { %853 = vmatpush3.bf16.msra.mxu1 %v1114_v3 }
 0x253   :  { %854 = vmatprep.subr.bf16.mxu1 %v1010_v0 }
 0x256   :  { %855 = vmatpush3.bf16.msra.mxu1 %v1119_v4 }
 0x257   :  { %856 = vmatprep.subr.bf16.mxu1 %v1010_v0 }
 0x25a   :  { %857 = vmatpush3.bf16.msra.mxu1 %v1125_v5 }
 0x25b   :  { %858 = vmatprep.subr.bf16.mxu1 %v1010_v0 }
 0x25e   :  { %859 = vmatpush3.bf16.msra.mxu1 %v1136_v7 }
 0x25f   :  { %860 = vmatprep.subr.bf16.mxu1 %v1010_v0 }
 0x262   :  { %861 = vmatpush3.bf16.msra.mxu1 %v1145_v10 }
 0x263   :  { %862 = vmatprep.subr.bf16.mxu1 %v1010_v0 }
 0x266   :  { %863 = vmatpush3.bf16.msra.mxu1 %v1152_v12 }
 0x267   :  { %868 = vmatprep.subr.bf16.mxu1 %v1010_v0 }
 0x31c   :  { %v370_v43 = vpop.f32.mrb[4].mxu1 }
 0x31d   :  { %v371_v44 = vadd.f32 %v638_v42, %v370_v43  ;;  %v806_v45 = vpop.f32.mrb[5].mxu1 }
 0x31e   :  { %v373_v46 = vpop.f32.mrb[6].mxu1 }
 0x31f   :  { %v376_v47 = vpack.c.bf16 %v371_v44, %v371_v44  ;;  %v807_v48 = vpop.f32.mrb[7].mxu1 }
 0x321   :  { %v377_v49 = vunpack.c.l.bf16 %v376_v47 }
 0x323   :  { %v378_v50 = vsub.f32 %v371_v44, %v377_v49 }
 0x325   :  { %v379_v51 = vpack.c.bf16 %v378_v50, %v378_v50 }
 0x327   :  { %825 = vmatmul.mubr.bf16.vlgmr.msra.gmra.mrb[4].mxu0 %v379_v51 }
 0x328   :  { %829 = vmatpush3.bf16.msra.mxu0 %v1105_v1  ;;  %844 = vmatprep.mubr.msk.bf16.mxu0 %vm1011_vm0, %v1010_v0  ;;  %v924_v1 = vld [vmem:[#allocation4 + $0x28] sm:$0xff]  }
 0x329   :  { %830 = vmatprep.subr.bf16.mxu0 %v1010_v0 }
 0x32c   :  { %831 = vmatpush3.bf16.msra.mxu0 %v1108_v2  ;;  %v925_v2 = vld [vmem:[#allocation4 + $0x30] sm:$0xff]  }
 0x32d   :  { %832 = vmatprep.subr.bf16.mxu0 %v1010_v0 }
 0x330   :  { %833 = vmatpush3.bf16.msra.mxu0 %v1114_v3  ;;  %v926_v3 = vld [vmem:[#allocation4 + $0x38] sm:$0xff]  }
 0x331   :  { %834 = vmatprep.subr.bf16.mxu0 %v1010_v0 }
 0x334   :  { %835 = vmatpush3.bf16.msra.mxu0 %v1119_v4 }
 0x335   :  { %836 = vmatprep.subr.bf16.mxu0 %v1010_v0 }
 0x338   :  { %837 = vmatpush3.bf16.msra.mxu0 %v1125_v5 }
 0x339   :  { %838 = vmatprep.subr.bf16.mxu0 %v1010_v0 }
 0x33c   :  { %839 = vmatpush3.bf16.msra.mxu0 %v1136_v7 }
 0x33d   :  { %840 = vmatprep.subr.bf16.mxu0 %v1010_v0 }
 0x340   :  { %841 = vmatpush3.bf16.msra.mxu0 %v1145_v10 }
 0x341   :  { %842 = vmatprep.subr.bf16.mxu0 %v1010_v0 }
 0x344   :  { %843 = vmatpush3.bf16.msra.mxu0 %v1152_v12 }
 0x347   :  { %845 = vmatmul.mubr.bf16.vlgmr.msra.gmra.mrb[4].mxu0 %v376_v47 }
 0x41a   :  { %v454_v52 = vpop.f32.mrb[4].mxu0 }
 0x41b   :  { %v460_v53 = vsub.f32 %v371_v44, %v454_v52  ;;  %v846_v54 = vpop.f32.mrb[5].mxu0 }
 0x41c   :  { %v457_v55 = vpop.f32.mrb[6].mxu0 }
 0x41d   :  { %v461_v56 = vmul.f32 %v460_v53, %v460_v53  ;;  %v847_v57 = vpop.f32.mrb[7].mxu0 }
 0x41f   :  { %v462_v58 = vpack.c.bf16 %v461_v56, %v461_v56 }
 0x421   :  { %865 = vmatmul.mubr.bf16.vlgmr.msra.gmra.mrb[8].mxu1 %v462_v58 }
 0x422   :  { %884 = vmatprep.mubr.msk.bf16.mxu1 %vm1011_vm0, %v1010_v0  ;;  %869 = vmatpush3.bf16.msra.mxu1 %v919_v59 }
 0x423   :  { %870 = vmatprep.subr.bf16.mxu1 %v1010_v0 }
 0x426   :  { %871 = vmatpush3.bf16.msra.mxu1 %v920_v60 }
 0x427   :  { %872 = vmatprep.subr.bf16.mxu1 %v1010_v0 }
 0x42a   :  { %873 = vmatpush3.bf16.msra.mxu1 %v921_v61 }
 0x42b   :  { %874 = vmatprep.subr.bf16.mxu1 %v1010_v0 }
 0x42e   :  { %875 = vmatpush3.bf16.msra.mxu1 %v922_v62 }
 0x42f   :  { %876 = vmatprep.subr.bf16.mxu1 %v1010_v0 }
 0x432   :  { %877 = vmatpush3.bf16.msra.mxu1 %v923_v63 }
 0x433   :  { %878 = vmatprep.subr.bf16.mxu1 %v1010_v0 }
 0x436   :  { %879 = vmatpush3.bf16.msra.mxu1 %v924_v1 }
 0x437   :  { %880 = vmatprep.subr.bf16.mxu1 %v1010_v0 }
 0x43a   :  { %881 = vmatpush3.bf16.msra.mxu1 %v925_v2 }
 0x43b   :  { %882 = vmatprep.subr.bf16.mxu1 %v1010_v0  ;;  %v647_v0 = vld [vmem:[%s1266_s4] ss:$0 sm:$0xff] }
 0x43e   :  { %883 = vmatpush3.bf16.msra.mxu1 %v926_v3 }
 0x4f4   :  { %v497_v4 = vpop.f32.mrb[8].mxu1 }
 0x4f5   :  { %v498_v5 = vadd.f32 1e-06, %v497_v4  ;;  %v866_v7 = vpop.f32.mrb[9].mxu1 }
 0x4f6   :  { %v500_v8 = vpop.f32.mrb[10].mxu1 }
 0x4f7   :  { %931 = vrsqrt.f32 %v498_v5  ;;  %v867_v9 = vpop.f32.mrb[11].mxu1 }
 0x501   :  { %v932_v10 = vpop.eup %931 }
 0x502   :  { %v504_v11 = vmul.f32 %v932_v10, %v460_v53 }
 0x504   :  { %v505_v12 = vmul.f32 0.5, %v504_v11 }
 0x506   :  { %933 = vtanh.f32 %v505_v12 }
 0x510   :  { %v934_v13 = vpop.eup %933 }
 0x511   :  { %v507_v14 = vmul.f32 0.5, %v934_v13 }
 0x513   :  { %v508_v15 = vadd.f32 0.5, %v507_v14 }
 0x515   :  { %v509_v16 = vmul.f32 %v508_v15, %v504_v11 }
 0x517   :  { %v510_v17 = vpack.c.bf16 %v509_v16, %v509_v16 }
 0x519   :  { %885 = vmatmul.mubr.bf16.vlgmr.msra.gmra.mrb[12].mxu1 %v510_v17 }
 0x5ec   :  { %v616_v18 = vpop.f32.mrb[12].mxu1 }
 0x5ed   :  { %v617_v19 = vadd.f32 %v647_v0, %v616_v18  ;;  %v886_v20 = vpop.f32.mrb[13].mxu1 }
 0x5ee   :  { %v619_v21 = vpop.f32.mrb[14].mxu1 }
 0x5ef   :  { %v622_v22 = vadd.f32 %v617_v19, %v1130_v6  ;;  %v887_v23 = vpop.f32.mrb[15].mxu1 }
 0x5f1   :  { %623 = vst [vmem:[%s1268_s6] sm:$0xf] %v622_v22 }
 0x5f2   :  { %628 = vsyncpa [#allocation3], 1 }
 0x5f3   :  { %629 = vsyncpa [#allocation5], 1 }

</bundles_post_ra>
